<compile_context>
chip_gen: v6e
topology: v6e:2x2x1
jax: 0.10.0
libtpu: 0.0.40
codegen_flags: <defaults>
</compile_context>

<pallas_src>
import functools

import jax
import jax.numpy as jnp
from jax.experimental import pallas as pl
from jax.experimental.pallas import tpu as pltpu


# ----------------------------------------------------------------------------
# Pallas kernel: one SAGE layer, tiled over node rows (i) and the node
# contraction (k) of the mean-aggregation matmul.
# ----------------------------------------------------------------------------
def _sage_layer_kernel(a_ref, xk_ref, xi_ref, wl_ref, wr_ref, b_ref, *rest,
                       apply_bn_relu):
    if apply_bn_relu:
        scale_ref, shift_ref, o_ref, acc_ref = rest
    else:
        o_ref, acc_ref = rest

    k = pl.program_id(1)

    @pl.when(k == 0)
    def _init():
        acc_ref[...] = jnp.zeros_like(acc_ref)

    # Dominant matmul: bf16 inputs on the MXU, f32 accumulation in VMEM.
    #   acc[i] += A[i, k] @ X[k]   -> running neighbor mean, shape (TM, Cin_p)
    acc_ref[...] += jnp.dot(a_ref[...], xk_ref[...],
                            preferred_element_type=jnp.float32)

    @pl.when(k == pl.num_programs(1) - 1)
    def _finalize():
        agg = acc_ref[...]                                     # f32 (TM, Cin_p)
        h = (jnp.dot(agg, wl_ref[...],
                     preferred_element_type=jnp.float32)
             + jnp.dot(xi_ref[...].astype(jnp.float32), wr_ref[...],
                       preferred_element_type=jnp.float32)
             + b_ref[...])
        if apply_bn_relu:
            # Eval-mode BatchNorm1d folded into scale/shift, then ReLU (f32).
            h = h * scale_ref[...] + shift_ref[...]
            h = jnp.maximum(h, 0.0)
        o_ref[...] = h.astype(o_ref.dtype)


def sage_layer(a_p, x_p, w_l_p, w_r_p, b_p, scale_p, shift_p, *,
               apply_bn_relu, out_dtype, tm=128, tk=128):
    """One SAGEConv (+ optional BN/ReLU) layer via a tiled pallas_call.

    a_p            : [NP, NP]        bf16 row-normalized adjacency (padded)
    x_p            : [NP, Cin_p]     bf16 node features (padded, lane-dense)
    w_l_p, w_r_p   : [Cin_p, Cout_p] f32 (already transposed + zero-padded)
    b_p            : [1, Cout_p]     f32
    scale_p/shift_p: [1, Cout_p]     f32 (only when apply_bn_relu)
    """
    np_nodes, cin_p = x_p.shape
    cout_p = w_l_p.shape[1]
    assert np_nodes % tm == 0 and np_nodes % tk == 0
    gm, gk = np_nodes // tm, np_nodes // tk

    kernel = functools.partial(_sage_layer_kernel, apply_bn_relu=apply_bn_relu)

    in_specs = [
        pl.BlockSpec((tm, tk), lambda i, k: (i, k)),          # A tile
        pl.BlockSpec((tk, cin_p), lambda i, k: (k, 0)),       # X (aggregated)
        pl.BlockSpec((tm, cin_p), lambda i, k: (i, 0)),       # X rows (self)
        pl.BlockSpec((cin_p, cout_p), lambda i, k: (0, 0)),   # W_l (resident)
        pl.BlockSpec((cin_p, cout_p), lambda i, k: (0, 0)),   # W_r (resident)
        pl.BlockSpec((1, cout_p), lambda i, k: (0, 0)),       # bias
    ]
    operands = [a_p, x_p, x_p, w_l_p, w_r_p, b_p]
    if apply_bn_relu:
        in_specs += [pl.BlockSpec((1, cout_p), lambda i, k: (0, 0)),
                     pl.BlockSpec((1, cout_p), lambda i, k: (0, 0))]
        operands += [scale_p, shift_p]

    return pl.pallas_call(
        kernel,
        out_shape=jax.ShapeDtypeStruct((np_nodes, cout_p), out_dtype),
        grid=(gm, gk),
        in_specs=in_specs,
        out_specs=pl.BlockSpec((tm, cout_p), lambda i, k: (i, 0)),
        scratch_shapes=[pltpu.VMEM((tm, cin_p), jnp.float32)],
        compiler_params=pltpu.CompilerParams(
            dimension_semantics=("parallel", "arbitrary")),
    )(*operands)


# ----------------------------------------------------------------------------
# Glue: dense mean-aggregation matrix from edge_index (plain JAX).
# ----------------------------------------------------------------------------
def build_mean_adjacency(edge_index, num_nodes):
    """edge_index: [2, E] int32, row 0 = src, row 1 = dst (PyG convention)."""
    src, dst = edge_index[0], edge_index[1]
    a = jnp.zeros((num_nodes, num_nodes), jnp.float32)
    a = a.at[dst, src].add(1.0)
    deg = jnp.sum(a, axis=1, keepdims=True)
    return a / jnp.maximum(deg, 1.0)   # mean aggr; isolated nodes -> zero row


def _round_up(v, m):
    return ((v + m - 1) // m) * m


def _pad2(x, rows, cols):
    return jnp.pad(x, ((0, rows - x.shape[0]), (0, cols - x.shape[1])))


# ----------------------------------------------------------------------------
# Parameter construction (deterministic, matches module __init__ shapes).
# ----------------------------------------------------------------------------
def init_sage_params(key, in_channels, hidden_channels, out_channels,
                     num_layers=2):
    dims = [in_channels] + [hidden_channels] * (num_layers - 1) + [out_channels]
    convs, bns = [], []
    for i in range(num_layers):
        cin, cout = dims[i], dims[i + 1]
        key, k1, k2, k3 = jax.random.split(key, 4)
        bound = 1.0 / jnp.sqrt(cin)
        w_l = jax.random.uniform(k1, (cout, cin), jnp.float32, -bound, bound)
        w_r = jax.random.uniform(k2, (cout, cin), jnp.float32, -bound, bound)
        b_l = jax.random.uniform(k3, (cout,), jnp.float32, -bound, bound)
        convs.append({"w_l": w_l, "w_r": w_r, "b_l": b_l})
        if i < num_layers - 1:
            key, k4, k5, k6 = jax.random.split(key, 4)
            gamma = jax.random.uniform(k4, (cout,), jnp.float32, 0.5, 1.5)
            beta = jax.random.uniform(k5, (cout,), jnp.float32, -0.5, 0.5)
            run_mean = jax.random.normal(k6, (cout,), jnp.float32) * 0.1
            run_var = jnp.ones((cout,), jnp.float32)
            bns.append({"gamma": gamma, "beta": beta,
                        "running_mean": run_mean, "running_var": run_var})
    return convs, bns


# ----------------------------------------------------------------------------
# Forward pass: pad to lane-dense shapes, carry padded hidden state, slice out.
# ----------------------------------------------------------------------------
def sage_forward(x, edge_index, convs, bns, return_hidden=False, eps=1e-5,
                 node_tile=128):
    n, c_in = x.shape
    np_nodes = _round_up(n, node_tile)

    a = build_mean_adjacency(edge_index, n)
    a_p = _pad2(a, np_nodes, np_nodes).astype(jnp.bfloat16)

    cin_p = _round_up(c_in, 128)
    h_p = _pad2(x, np_nodes, cin_p).astype(jnp.bfloat16)
    c_cur = c_in

    num_layers = len(convs)
    for i in range(num_layers - 1):
        c, bn = convs[i], bns[i]
        cout = c["w_l"].shape[0]
        cout_p = _round_up(cout, 128)
        w_l_p = _pad2(c["w_l"].T, cin_p, cout_p)
        w_r_p = _pad2(c["w_r"].T, cin_p, cout_p)
        b_p = _pad2(c["b_l"][None, :], 1, cout_p)
        scale = bn["gamma"] / jnp.sqrt(bn["running_var"] + eps)
        shift = bn["beta"] - bn["running_mean"] * scale
        scale_p = _pad2(scale[None, :], 1, cout_p)
        shift_p = _pad2(shift[None, :], 1, cout_p)
        h_p = sage_layer(a_p, h_p, w_l_p, w_r_p, b_p, scale_p, shift_p,
                         apply_bn_relu=True, out_dtype=jnp.bfloat16,
                         tm=node_tile, tk=node_tile)
        # TODO(synk): F.dropout with training=True not implemented; forward
        # matches inference (training=False), where dropout is the identity.
        cin_p = cout_p
        c_cur = cout

    if return_hidden:
        return h_p[:n, :c_cur].astype(jnp.float32)

    c = convs[-1]
    cout = c["w_l"].shape[0]
    cout_p = _round_up(cout, 128)
    w_l_p = _pad2(c["w_l"].T, cin_p, cout_p)
    w_r_p = _pad2(c["w_r"].T, cin_p, cout_p)
    b_p = _pad2(c["b_l"][None, :], 1, cout_p)
    out_p = sage_layer(a_p, h_p, w_l_p, w_r_p, b_p, None, None,
                       apply_bn_relu=False, out_dtype=jnp.float32,
                       tm=node_tile, tk=node_tile)
    return out_p[:n, :cout]


# ----------------------------------------------------------------------------
# Pure-JAX reference (mirrors the kernel's bf16 input rounding, f32 math).
# ----------------------------------------------------------------------------
def sage_reference(x, edge_index, convs, bns, eps=1e-5):
    with jax.default_matmul_precision("highest"):
        n = x.shape[0]
        a = build_mean_adjacency(edge_index, n).astype(jnp.bfloat16).astype(jnp.float32)
        h = x.astype(jnp.bfloat16).astype(jnp.float32)
        for i in range(len(convs) - 1):
            c, bn = convs[i], bns[i]
            h = (a @ h) @ c["w_l"].T + h @ c["w_r"].T + c["b_l"]
            scale = bn["gamma"] / jnp.sqrt(bn["running_var"] + eps)
            shift = bn["beta"] - bn["running_mean"] * scale
            h = jnp.maximum(h * scale + shift, 0.0)
            h = h.astype(jnp.bfloat16).astype(jnp.float32)
        c = convs[-1]
        return (a @ h) @ c["w_l"].T + h @ c["w_r"].T + c["b_l"]


if __name__ == "__main__":
    key = jax.random.PRNGKey(0)

    # Small synthetic graph.  200 nodes pads to 256 -> a 2x2 grid of 128-tiles,
    # which exercises both the accumulation over k and the parallel i axis.
    N, E = 200, 800
    IN_C, HID_C, OUT_C = 16, 32, 8
    NUM_LAYERS = 2

    key, kx, ke, kp = jax.random.split(key, 4)
    x = jax.random.normal(kx, (N, IN_C), jnp.float32)
    edge_index = jax.random.randint(ke, (2, E), 0, N, dtype=jnp.int32)

    convs, bns = init_sage_params(kp, IN_C, HID_C, OUT_C, num_layers=NUM_LAYERS)

    out = jax.block_until_ready(sage_forward(x, edge_index, convs, bns))
    assert out.shape == (N, OUT_C), out.shape
    assert jnp.all(jnp.isfinite(out))

    ref = jax.block_until_ready(sage_reference(x, edge_index, convs, bns))
    max_err = float(jnp.max(jnp.abs(out - ref)))
    assert max_err < 1e-2, f"max abs error vs reference: {max_err}"

    print("KERNEL_OK")
</pallas_src>

<mosaic_0001>
module attributes {stable_mosaic.version = 11 : i64} {
  func.func @_sage_layer_kernel(%arg0: i32, %arg1: i32, %arg2: memref<128x128xbf16, #tpu.memory_space<vmem>>, %arg3: memref<128x128xbf16, #tpu.memory_space<vmem>>, %arg4: memref<128x128xbf16, #tpu.memory_space<vmem>>, %arg5: memref<128x128xf32, #tpu.memory_space<vmem>>, %arg6: memref<128x128xf32, #tpu.memory_space<vmem>>, %arg7: memref<1x128xf32, #tpu.memory_space<vmem>>, %arg8: memref<1x128xf32, #tpu.memory_space<vmem>>, %arg9: memref<1x128xf32, #tpu.memory_space<vmem>>, %arg10: memref<128x128xbf16, #tpu.memory_space<vmem>>, %arg11: memref<128x128xf32, #tpu.memory_space<vmem>>) attributes {dimension_semantics = [#tpu.dimension_semantics<parallel>, #tpu.dimension_semantics<arbitrary>], iteration_bounds = array<i64: 2, 2>, scalar_prefetch = 0 : i64, scratch_operands = 1 : i64, tpu.core_type = #tpu.core_type<tc>, window_params = [{transform_indices = @transform_0, window_bounds = array<i64: 128, 128>}, {transform_indices = @transform_1, window_bounds = array<i64: 128, 128>}, {transform_indices = @transform_2, window_bounds = array<i64: 128, 128>}, {pipeline_mode = #tpu.pipeline_mode<synchronous>, transform_indices = @transform_3, window_bounds = array<i64: 128, 128>}, {pipeline_mode = #tpu.pipeline_mode<synchronous>, transform_indices = @transform_4, window_bounds = array<i64: 128, 128>}, {pipeline_mode = #tpu.pipeline_mode<synchronous>, transform_indices = @transform_5, window_bounds = array<i64: 1, 128>}, {pipeline_mode = #tpu.pipeline_mode<synchronous>, transform_indices = @transform_6, window_bounds = array<i64: 1, 128>}, {pipeline_mode = #tpu.pipeline_mode<synchronous>, transform_indices = @transform_7, window_bounds = array<i64: 1, 128>}, {transform_indices = @transform_8, window_bounds = array<i64: 128, 128>}]} {
    %c0_i32 = arith.constant 0 : i32
    %0 = arith.cmpi eq, %arg1, %c0_i32 : i32
    %1 = arith.extui %0 : i1 to i32
    %c0_i32_0 = arith.constant 0 : i32
    %2 = arith.cmpi ne, %1, %c0_i32_0 : i32
    scf.if %2 {
      %cst_9 = arith.constant 0.000000e+00 : f32
      %12 = vector.broadcast %cst_9 : f32 to vector<128x128xf32>
      %c0_10 = arith.constant 0 : index
      %c0_11 = arith.constant 0 : index
      %13 = vector.load %arg11[%c0_10, %c0_11] : memref<128x128xf32, #tpu.memory_space<vmem>>, vector<128x128xf32>
      tpu.vector_store %arg11[%c0_10, %c0_11], %12 {strides = array<i32>} : memref<128x128xf32, #tpu.memory_space<vmem>>, vector<128x128xf32>,
    } else {
    }
    %c0 = arith.constant 0 : index
    %c0_1 = arith.constant 0 : index
    %3 = vector.load %arg11[%c0, %c0_1] : memref<128x128xf32, #tpu.memory_space<vmem>>, vector<128x128xf32>
    %c0_2 = arith.constant 0 : index
    %c0_3 = arith.constant 0 : index
    %4 = vector.load %arg2[%c0_2, %c0_3] : memref<128x128xbf16, #tpu.memory_space<vmem>>, vector<128x128xbf16>
    %c0_4 = arith.constant 0 : index
    %c0_5 = arith.constant 0 : index
    %5 = vector.load %arg3[%c0_4, %c0_5] : memref<128x128xbf16, #tpu.memory_space<vmem>>, vector<128x128xbf16>
    %cst = arith.constant dense<0.000000e+00> : vector<128x128xf32>
    %6 = tpu.matmul %4, %5, %cst {dimension_numbers = #tpu.dot_dimension_numbers<[1], [0], [0], [1], [0, 0, 1, 1], [], []>} : vector<128x128xbf16>, vector<128x128xbf16>, vector<128x128xf32> -> vector<128x128xf32>
    %7 = arith.addf %3, %6 : vector<128x128xf32>
    %c0_6 = arith.constant 0 : index
    %c0_7 = arith.constant 0 : index
    %8 = vector.load %arg11[%c0_6, %c0_7] : memref<128x128xf32, #tpu.memory_space<vmem>>, vector<128x128xf32>
    tpu.vector_store %arg11[%c0_6, %c0_7], %7 {strides = array<i32>} : memref<128x128xf32, #tpu.memory_space<vmem>>, vector<128x128xf32>,
    %c1_i32 = arith.constant 1 : i32
    %9 = arith.cmpi eq, %arg1, %c1_i32 : i32
    %10 = arith.extui %9 : i1 to i32
    %c0_i32_8 = arith.constant 0 : i32
    %11 = arith.cmpi ne, %10, %c0_i32_8 : i32
    scf.if %11 {
      %c0_9 = arith.constant 0 : index
      %c0_10 = arith.constant 0 : index
      %12 = vector.load %arg11[%c0_9, %c0_10] : memref<128x128xf32, #tpu.memory_space<vmem>>, vector<128x128xf32>
      %c0_11 = arith.constant 0 : index
      %c0_12 = arith.constant 0 : index
      %13 = vector.load %arg5[%c0_11, %c0_12] : memref<128x128xf32, #tpu.memory_space<vmem>>, vector<128x128xf32>
      %cst_13 = arith.constant dense<0.000000e+00> : vector<128x128xf32>
      %14 = tpu.matmul %12, %13, %cst_13 {dimension_numbers = #tpu.dot_dimension_numbers<[1], [0], [0], [1], [0, 0, 1, 1], [], []>} : vector<128x128xf32>, vector<128x128xf32>, vector<128x128xf32> -> vector<128x128xf32>
      %c0_14 = arith.constant 0 : index
      %c0_15 = arith.constant 0 : index
      %15 = vector.load %arg4[%c0_14, %c0_15] : memref<128x128xbf16, #tpu.memory_space<vmem>>, vector<128x128xbf16>
      %16 = arith.extf %15 : vector<128x128xbf16> to vector<128x128xf32>
      %c0_16 = arith.constant 0 : index
      %c0_17 = arith.constant 0 : index
      %17 = vector.load %arg6[%c0_16, %c0_17] : memref<128x128xf32, #tpu.memory_space<vmem>>, vector<128x128xf32>
      %cst_18 = arith.constant dense<0.000000e+00> : vector<128x128xf32>
      %18 = tpu.matmul %16, %17, %cst_18 {dimension_numbers = #tpu.dot_dimension_numbers<[1], [0], [0], [1], [0, 0, 1, 1], [], []>} : vector<128x128xf32>, vector<128x128xf32>, vector<128x128xf32> -> vector<128x128xf32>
      %19 = arith.addf %14, %18 : vector<128x128xf32>
      %c0_19 = arith.constant 0 : index
      %c0_20 = arith.constant 0 : index
      %20 = vector.load %arg7[%c0_19, %c0_20] : memref<1x128xf32, #tpu.memory_space<vmem>>, vector<1x128xf32>
      %21 = vector.broadcast %20 : vector<1x128xf32> to vector<128x128xf32>
      %22 = arith.addf %19, %21 : vector<128x128xf32>
      %c0_21 = arith.constant 0 : index
      %c0_22 = arith.constant 0 : index
      %23 = vector.load %arg8[%c0_21, %c0_22] : memref<1x128xf32, #tpu.memory_space<vmem>>, vector<1x128xf32>
      %24 = vector.broadcast %23 : vector<1x128xf32> to vector<128x128xf32>
      %25 = arith.mulf %22, %24 : vector<128x128xf32>
      %c0_23 = arith.constant 0 : index
      %c0_24 = arith.constant 0 : index
      %26 = vector.load %arg9[%c0_23, %c0_24] : memref<1x128xf32, #tpu.memory_space<vmem>>, vector<1x128xf32>
      %27 = vector.broadcast %26 : vector<1x128xf32> to vector<128x128xf32>
      %28 = arith.addf %25, %27 : vector<128x128xf32>
      %cst_25 = arith.constant 0.000000e+00 : f32
      %29 = vector.broadcast %cst_25 : f32 to vector<128x128xf32>
      %30 = arith.maximumf %28, %29 : vector<128x128xf32>
      %31 = arith.truncf %30 : vector<128x128xf32> to vector<128x128xbf16>
      %c0_26 = arith.constant 0 : index
      %c0_27 = arith.constant 0 : index
      %32 = vector.load %arg10[%c0_26, %c0_27] : memref<128x128xbf16, #tpu.memory_space<vmem>>, vector<128x128xbf16>
      tpu.vector_store %arg10[%c0_26, %c0_27], %31 {strides = array<i32>} : memref<128x128xbf16, #tpu.memory_space<vmem>>, vector<128x128xbf16>,
    } else {
    }
    return
  }
  func.func @transform_0(%arg0: i32, %arg1: i32) -> (i32, i32) {
    %c0_i32 = arith.constant 0 : i32
    return %arg0, %arg1 : i32, i32
  }
  func.func @transform_1(%arg0: i32, %arg1: i32) -> (i32, i32) {
    %c0_i32 = arith.constant 0 : i32
    %c0_i32_0 = arith.constant 0 : i32
    return %arg1, %c0_i32 : i32, i32
  }
  func.func @transform_2(%arg0: i32, %arg1: i32) -> (i32, i32) {
    %c0_i32 = arith.constant 0 : i32
    %c0_i32_0 = arith.constant 0 : i32
    return %arg0, %c0_i32 : i32, i32
  }
  func.func @transform_3(%arg0: i32, %arg1: i32) -> (i32, i32) {
    %c0_i32 = arith.constant 0 : i32
    %c0_i32_0 = arith.constant 0 : i32
    %c0_i32_1 = arith.constant 0 : i32
    return %c0_i32, %c0_i32_0 : i32, i32
  }
  func.func @transform_4(%arg0: i32, %arg1: i32) -> (i32, i32) {
    %c0_i32 = arith.constant 0 : i32
    %c0_i32_0 = arith.constant 0 : i32
    %c0_i32_1 = arith.constant 0 : i32
    return %c0_i32, %c0_i32_0 : i32, i32
  }
  func.func @transform_5(%arg0: i32, %arg1: i32) -> (i32, i32) {
    %c0_i32 = arith.constant 0 : i32
    %c0_i32_0 = arith.constant 0 : i32
    %c0_i32_1 = arith.constant 0 : i32
    return %c0_i32, %c0_i32_0 : i32, i32
  }
  func.func @transform_6(%arg0: i32, %arg1: i32) -> (i32, i32) {
    %c0_i32 = arith.constant 0 : i32
    %c0_i32_0 = arith.constant 0 : i32
    %c0_i32_1 = arith.constant 0 : i32
    return %c0_i32, %c0_i32_0 : i32, i32
  }
  func.func @transform_7(%arg0: i32, %arg1: i32) -> (i32, i32) {
    %c0_i32 = arith.constant 0 : i32
    %c0_i32_0 = arith.constant 0 : i32
    %c0_i32_1 = arith.constant 0 : i32
    return %c0_i32, %c0_i32_0 : i32, i32
  }
  func.func @transform_8(%arg0: i32, %arg1: i32) -> (i32, i32) {
    %c0_i32 = arith.constant 0 : i32
    %c0_i32_0 = arith.constant 0 : i32
    return %arg0, %c0_i32 : i32, i32
  }
}

</mosaic_0001>

<bundles_post_ra>
// kernel: tpu_custom_call.1
= control target key start
LH: loop header
LB: loop body
LE: loop exit
PB: predicated region body
PF: predicated region fallthrough
CT: control target
= control target key end

     0   :  { %s2866_s0 = inlined_call_operand.hbm [shape: bf16[256,256], index: 0, kind: input, shape index: {}]   ;;  %s2867_s1 = inlined_call_operand.hbm [shape: bf16[256,128], index: 1, kind: input, shape index: {}]   ;;  %s2868_s2 = inlined_call_operand.hbm [shape: bf16[256,128], index: 2, kind: input, shape index: {}]   ;;  %s2869_s3 = inlined_call_operand.hbm [shape: f32[128,128], index: 3, kind: input, shape index: {}]   ;;  %s2870_s4 = inlined_call_operand.hbm [shape: f32[128,128], index: 4, kind: input, shape index: {}]   ;;  %s2871_s5 = inlined_call_operand.vmem [shape: f32[1,128], index: 5, kind: input, shape index: {}]   ;;  %s2872_s6 = inlined_call_operand.vmem [shape: f32[1,128], index: 6, kind: input, shape index: {}]   ;;  %s2873_s7 = inlined_call_operand.vmem [shape: f32[1,128], index: 7, kind: input, shape index: {}]   ;;  %s2874_s8 = inlined_call_operand.hbm [shape: bf16[256,128], index: 8, kind: output, shape index: {}]  }
   0x1   :  { %2894 = sst [smem:[#allocation26_spill]] %s2866_s0 }
   0x2   :  { %2895 = sst [smem:[#allocation27_spill]] %s2867_s1 }
   0x3   :  { %2896 = sst [smem:[#allocation28_spill]] %s2868_s2 }
   0x4   :  { %2897 = sst [smem:[#allocation29_spill]] %s2869_s3 }
   0x5   :  { %2898 = sst [smem:[#allocation30_spill]] %s2870_s4 }
   0x6   :  { %2899 = sst [smem:[#allocation31_spill]] %s2871_s5 }
   0x7   :  { %2900 = sst [smem:[#allocation32_spill]] %s2872_s6 }
   0x8   :  { %2901 = sst [smem:[#allocation33_spill]] %s2873_s7 }
   0x9   :  { %2902 = sst [smem:[#allocation34_spill]] %s2874_s8 }
   0xa   :  { %13 = vsyncpa [#allocation4], 0 }
   0xb   :  { %15 = vsyncpa [#allocation4 + $0x1], 0 }
   0xc   :  { %16 = vsyncpa [#allocation7], 0 }
   0xd   :  { %18 = vsyncpa [#allocation7 + $0x1], 0 }
   0xe   :  { %19 = vsyncpa [#allocation10], 0 }
   0xf   :  { %20 = vsyncpa [#allocation5], 0 }
  0x10   :  { %22 = vsyncpa [#allocation5 + $0x1], 0  ;;  %s2388_s27 = smov 0   ;;  %s2390_s28 = smov 0  }
  0x11   :  { %s2392_s29 = smov 0   ;;  %s2394_s30 = smov 0  }
  0x12   :  { %s2396_s9 = smov 0   ;;  %s2398_s10 = smov 0  }
  0x13   :  { %s2400_s11 = smov 0   ;;  %s2402_s12 = smov 0  }
  0x14   :  { %s2404_s13 = smov 0   ;;  %s2406_s14 = smov 0  }
  0x15   :  { %s2408_s15 = smov 0   ;;  %s2410_s16 = smov 0  }
  0x16   :  { %s2412_s17 = smov 0   ;;  %s2414_s18 = smov 0  }
  0x17 LB: > { %2903 = sst [smem:[#allocation18_spill]] %s2292_s9  ;;  %s2459_s19 = sadd.s32 4294967295, %s2328_s18   ;;  %s2328_s18 = sphi %s2414_s18, %s28_s18   ;;  %s2324_s17 = sphi %s2412_s17, %s2972_s17   ;;  %s2320_s16 = sphi %s2410_s16, %s2971_s16   ;;  %s2316_s15 = sphi %s2408_s15, %s2970_s15   ;;  %s2312_s14 = sphi %s2406_s14, %s2969_s14   ;;  %s2308_s13 = sphi %s2404_s13, %s2968_s13   ;;  %s2304_s12 = sphi %s2402_s12, %s2967_s12   ;;  %s2300_s11 = sphi %s2400_s11, %s2966_s11   ;;  %s2296_s10 = sphi %s2398_s10, %s2965_s10   ;;  %s2292_s9 = sphi %s2396_s9, %s2964_s9   ;;  %s2288_s30 = sphi %s2394_s30, %s2957_s30   ;;  %s2284_s29 = sphi %s2392_s29, %s2963_s29   ;;  %s2280_s28 = sphi %s2390_s28, %s2962_s28   ;;  %s2276_s27 = sphi %s2388_s27, %s2961_s27  }
  0x18   : > { %2904 = sst [smem:[#allocation19_spill]] %s2312_s14  ;;  %p1447_p0 = scmp.ge.s32.totalorder %s2328_s18, 1 }
  0x19   : > { %2905 = sst [smem:[#allocation20_spill]] %s2316_s15  ;;  %p2886_p1 = scmp.eq.s32.totalorder %s2459_s19, 0 }
  0x1a   : > { %p256_p3 = scmp.lt.s32.totalorder %s2328_s18, 5  ;;  %s2330_s21 = smov [#allocation9]  }
  0x1b   : > { %s268_s22 = sshll.u32 %s2330_s21, 4  ;;  %s269_s22 = int_to_ptr.vmem [resolvable:$true] %s268_s22 }
  0x1c   : > { %p2465_p4 = pnand %p1447_p0, %p256_p3  ;;  %s2047_s24 = scalar_lea.vmem %s269_s22, 2048 }
  0x1d   : > { %p2048_p8 = scmp.ne.s32.totalorder %s269_s22, %s2047_s24  ;;  %p2055_p11 = scmp.lt.s32.totalorder %s269_s22, %s269_s22 }
  0x1e   : > { %s2906_s20 = scalar_select %p2465_p4, 1, 0 }
  0x1f   : > { %p1872_p5 = pneg %p2465_p4  ;;  %p2056_p12 = scmp.lt.s32.totalorder %s2047_s24, %s2047_s24 }
  0x20   : > { %2907 = sst [smem:[#allocation21_spill]] %s2906_s20 }
  0x21   : > { %p2473_p6 = pnand %p1872_p5, %p2886_p1  ;;  %p2057_p13 = por %p2056_p12, %p2055_p11 }
  0x23   : > { %p2038_p7 = pneg %p2473_p6 }
  0x25   : > { %p2050_p9 = pnand %p2048_p8, %p2038_p7 }
  0x27   : > { %p2051_p10 = pneg %p2050_p9 }
  0x29   : > { %p2058_p0 = pnand %p2057_p13, %p2051_p10 }
  0x2b   : > { %2061 = shalt.err (!%p2058_p0)
}
  0x2c   : > { %s2876_s25 = smov 128   ;;  %s2878_s26 = smov 8  }
  0x2d   : > { %s2909_s3 = sld [smem:[#allocation29_spill]]  ;;  %s37_s8 = sadd.s32 1, %s2320_s16 }
  0x2e   : > { %s40_s15 = sadd.s32 1, %s2324_s17  ;;  %p38_p3 = scmp.ge.s32.totalorder %s37_s8, 2 }
  0x2f   : > { %p2887_p5 = scmp.eq.s32.totalorder %s2328_s18, 0  ;;  %s75_s7 = sadd.s32 1, %s2296_s10 }
  0x30   : > { %p82_p8 = scmp.ne.s32.totalorder %s2296_s10, %s2292_s9  ;;  %s2974_s8 = smov (%p38_p3, %s37_s8), 0 }
  0x31   : > { %2910 = sst [smem:[#allocation22_spill]] %s2974_s8  ;;  %s2976_s15 = smov (!%p38_p3, %s40_s15), %s2324_s17 }
  0x32   : > { %s45_s6 = ssub.s32 %s2320_s16, %s2974_s8  ;;  %p2503_p9 = por %p82_p8, %p2887_p5 }
  0x33   : > { %1875 = dma.hbm_to_vmem [thread:$0]  (!%p2473_p6), %s2909_s3, 2048, %s269_s22, [#allocation10], %s2876_s25, %s2876_s25, %s2878_s26  }
  0x34   : > { %p42_p10 = scmp.ge.s32.totalorder %s2976_s15, 2  ;;  %p73_p11 = scmp.eq.s32.totalorder %s45_s6, 0 }
  0x35   : > { %p88_p12 = scmp.ne.s32.totalorder %s2292_s9, %s2288_s30  ;;  %p2885_p13 = scmp.lt.s32.totalorder %s2328_s18, 4 }
  0x36   : > { %s2978_s15 = smov (%p42_p10, %s2976_s15), 0  ;;  %s327_s3 = sand.u32 1, %s2328_s18  }
  0x37   : > { %2912 = sst [smem:[#allocation23_spill]] %s2978_s15  ;;  %s2517_s24 = ssub.s32 %s2324_s17, %s2978_s15 }
  0x38   : > { %s2513_s21 = scalar_select %p73_p11, %s2296_s10, %s75_s7  }
  0x39   : > { %p2521_p0 = por %p88_p12, %p2886_p1  ;;  %s46_s26 = sor.u32 %s45_s6, %s2517_s24 }
  0x3a   : > { %2913 = sst [smem:[#allocation24_spill]] %s2513_s21  ;;  %p2527_p8 = scmp.eq.s32.totalorder %s46_s26, 0 }
  0x3b   : > { %s2914_s25 = scalar_select %p2521_p0, 1, 0 }
  0x3c   : > { %s329_s8 = sand.u32 1, %s2296_s10   ;;  %s1511_s7 = sshll.u32 %s2320_s16, 10 }
  0x3d   : > { %2915 = sst [smem:[#allocation25_spill]] %s2914_s25  ;;  %s1455_s5 = sshll.u32 %s329_s8, 6 }
  0x3e   : > { %s2917_s1 = sld [smem:[#allocation27_spill]]  ;;  %s331_s9 = scalar_lea.vmem [#allocation6], %s1455_s5 }
  0x3f   : > { %s338_s20 = sshll.u32 %s331_s9, 4  ;;  %p2541_p10 = pnand %p2885_p13, %p2503_p9  ;;  %s339_s20 = int_to_ptr.vmem [resolvable:$true] %s338_s20 }
  0x40   : > { %s2333_s6 = smov [#allocation11]   ;;  %s2545_s2 = scalar_lea.sflag [#allocation7], %s327_s3 }
  0x41   : > { %s281_s26 = sshll.u32 %s2333_s6, 4  ;;  %p2064_p11 = pneg %p2541_p10  ;;  %s282_s26 = int_to_ptr.vmem [resolvable:$true] %s281_s26 }
  0x42   : > { %s2075_s8 = scalar_lea.vmem %s339_s20, 1024  ;;  %s2334_s5 = smov [#allocation6]  }
  0x43   : > { %p2076_p12 = scmp.ne.s32.totalorder %s339_s20, %s2075_s8  ;;  %s2080_s9 = sshll.u32 %s2334_s5, 4  ;;  %s2081_s9 = int_to_ptr.vmem [resolvable:$false] %s2080_s9 }
  0x44   : > { %s337_s14 = scalar_lea.hbm %s2917_s1, %s1511_s7  ;;  %s2082_s15 = scalar_lea.vmem %s2081_s9, 2048 }
  0x45   : > { %p2078_p2 = pnand %p2076_p12, %p2064_p11  ;;  %p2083_p9 = scmp.lt.s32.totalorder %s339_s20, %s2081_s9 }
  0x46   : > { %p2084_p13 = scmp.lt.s32.totalorder %s2082_s15, %s2075_s8 }
  0x47   : > { %p2079_p3 = pneg %p2078_p2 }
  0x48   : > { %p2085_p1 = por %p2084_p13, %p2083_p9 }
  0x4a   : > { %p2086_p5 = pnand %p2085_p1, %p2079_p3 }
  0x4c   : > { %2089 = shalt.err (!%p2086_p5)
}
  0x4d   : > { %s2888_s22 = smov 64   ;;  %s2890_s3 = smov 4  }
  0x4e   : > { %1885 = dma.hbm_to_vmem [thread:$0]  (!%p2541_p10), %s337_s14, 1024, %s339_s20, %s2545_s2, %s2888_s22, %s2888_s22, %s2890_s3  }
  0x4f   : > { %s2101_s21 = scalar_lea.vmem %s282_s26, 2048  ;;  %p2109_p13 = scmp.lt.s32.totalorder %s282_s26, %s282_s26 }
  0x50   : > { %p2102_p2 = scmp.ne.s32.totalorder %s282_s26, %s2101_s21  ;;  %p2110_p1 = scmp.lt.s32.totalorder %s2101_s21, %s2101_s21 }
  0x52   : > { %p2104_p11 = pnand %p2102_p2, %p2038_p7  ;;  %p2111_p5 = por %p2110_p1, %p2109_p13 }
  0x54   : > { %p2105_p12 = pneg %p2104_p11 }
  0x56   : > { %p2112_p3 = pnand %p2111_p5, %p2105_p12 }
  0x58   : > { %2115 = shalt.err (!%p2112_p3)
}
  0x59   : > { %s2919_s7 = smov 8   ;;  %s2920_s25 = smov 128  }
  0x5a   : > { %s2921_s4 = sld [smem:[#allocation30_spill]]  ;;  %s49_s14 = sadd.s32 1, %s2308_s13 }
  0x5b   : > { %s2570_s20 = scalar_select %p2527_p8, %s2308_s13, %s49_s14  }
  0x5c   : > { %p56_p7 = scmp.ne.s32.totalorder %s2308_s13, %s2304_s12  ;;  %p62_p10 = scmp.ne.s32.totalorder %s2304_s12, %s2300_s11 }
  0x5d   : > { %s304_s23 = sand.u32 1, %s2308_s13   ;;  %s1510_s5 = sshll.u32 %s2324_s17, 5 }
  0x5e   : > { %p2922_p9 = scmp.eq.s32.totalorder %s2328_s18, 0  ;;  %p2923_p11 = scmp.eq.s32.totalorder %s2459_s19, 0 }
  0x5f   : > { %s1451_s15 = sshll.u32 %s304_s23, 6  ;;  %s314_s21 = sadd.s32 %s2320_s16, %s1510_s5 }
  0x60   : > { %1878 = dma.hbm_to_vmem [thread:$0]  (!%p2473_p6), %s2921_s4, 2048, %s282_s26, [#allocation10], %s2920_s25, %s2920_s25, %s2919_s7  }
  0x61   : > { %p58_p2 = por %p2922_p9, %p56_p7  ;;  %p2582_p12 = por %p2923_p11, %p62_p10 }
  0x62   : > { %s1454_s6 = sshll.u32 %s314_s21, 6  ;;  %s308_s26 = scalar_lea.vmem [#allocation3], %s1451_s15 }
  0x63   : > { %s317_s7 = sshll.u32 %s308_s26, 4  ;;  %s2925_s0 = sld [smem:[#allocation26_spill]]  ;;  %s318_s7 = int_to_ptr.vmem [resolvable:$true] %s317_s7 }
  0x64   : > { %p2926_p6 = scmp.lt.s32.totalorder %s2328_s18, 4  ;;  %s305_s22 = scalar_lea.sflag [#allocation4], %s304_s23 }
  0x65   : > { %s2129_s3 = scalar_lea.vmem %s318_s7, 1024  ;;  %s2337_s5 = smov [#allocation3]  }
  0x66   : > { %p2592_p8 = pnand %p2926_p6, %p58_p2  ;;  %p2130_p1 = scmp.ne.s32.totalorder %s318_s7, %s2129_s3 }
  0x67   : > { %s2134_s15 = sshll.u32 %s2337_s5, 4  ;;  %s2135_s15 = int_to_ptr.vmem [resolvable:$false] %s2134_s15 }
  0x68   : > { %p2118_p13 = pneg %p2592_p8  ;;  %s2136_s21 = scalar_lea.vmem %s2135_s15, 2048 }
  0x69   : > { %s316_s14 = scalar_lea.hbm %s2925_s0, %s1454_s6  ;;  %p2137_p7 = scmp.lt.s32.totalorder %s318_s7, %s2135_s15 }
  0x6a   : > { %p2132_p5 = pnand %p2130_p1, %p2118_p13  ;;  %p2138_p10 = scmp.lt.s32.totalorder %s2136_s21, %s2129_s3 }
  0x6c   : > { %p2133_p3 = pneg %p2132_p5  ;;  %p2139_p9 = por %p2138_p10, %p2137_p7 }
  0x6e   : > { %p2140_p11 = pnand %p2139_p9, %p2133_p3 }
  0x70   : > { %2143 = shalt.err (!%p2140_p11)
}
  0x71   : > { %s2928_s6 = smov 4   ;;  %s2929_s26 = smov 64  }
  0x72   : > { %1882 = dma.hbm_to_vmem [thread:$0]  (!%p2592_p8), %s316_s14, 1024, %s318_s7, %s305_s22, %s2920_s25, %s2929_s26, %s2928_s6  }
  0x73   : > { %s1446_s3 = sadd.s32 4294967294, %s2328_s18   ;;  %s101_s23 = sadd.s32 1, %s2284_s29 }
  0x74   : > { %p2930_p2 = scmp.eq.s32.totalorder %s2517_s24, 0  ;;  %p108_p6 = scmp.ne.s32.totalorder %s2284_s29, %s2280_s28 }
  0x75   : > { %p114_p13 = scmp.ne.s32.totalorder %s2280_s28, %s2276_s27  ;;  %p249_p1 = scmp.eq.s32.totalorder %s1446_s3, 3 }
  0x76   : > { %s2608_s8 = scalar_select %p2930_p2, %s2284_s29, %s101_s23  }
  0x77   : > { %s350_s30 = sand.u32 1, %s2284_s29   ;;  %p2931_p5 = scmp.eq.s32.totalorder %s2328_s18, 0 }
  0x78   : > { %p2932_p7 = scmp.eq.s32.totalorder %s2459_s19, 0  ;;  %p2934_p9 = scmp.eq.s32.totalorder %s2459_s19, 3 }
  0x79   : > { %p110_p3 = por %p108_p6, %p2931_p5  ;;  %p2629_p8 = por %p249_p1, %p114_p13 }
  0x7a   : > { %p2619_p10 = por %p114_p13, %p2932_p7  ;;  %p2625_p11 = por %p2934_p9, %p108_p6 }
  0x7b   : > { %s2936_s24 = scalar_select %p2629_p8, 1, 0 }
  0x7c   : > { %s2933_s11 = scalar_select %p2619_p10, 1, 0 }
  0x7d   : > { %s2935_s22 = scalar_select %p2625_p11, 1, 0 }
  0x7e   : > { %s1458_s25 = sshll.u32 %s350_s30, 6  ;;  %s1512_s7 = sshll.u32 %s2324_s17, 10 }
  0x7f   : > { %s2937_s15 = sld [smem:[#allocation28_spill]]  ;;  %s352_s3 = scalar_lea.vmem [#allocation8], %s1458_s25 }
  0x80   : > { %s359_s23 = sshll.u32 %s352_s3, 4  ;;  %p2938_p2 = scmp.lt.s32.totalorder %s2328_s18, 4  ;;  %s360_s23 = int_to_ptr.vmem [resolvable:$true] %s359_s23 }
  0x81   : > { %s2157_s1 = scalar_lea.vmem %s360_s23, 1024  ;;  %s2338_s30 = smov [#allocation8]  }
  0x82   : > { %p2639_p5 = pnand %p2938_p2, %p110_p3  ;;  %p2158_p13 = scmp.ne.s32.totalorder %s360_s23, %s2157_s1 }
  0x83   : > { %s2162_s4 = sshll.u32 %s2338_s30, 4  ;;  %s2163_s4 = int_to_ptr.vmem [resolvable:$false] %s2162_s4 }
  0x84   : > { %p2146_p6 = pneg %p2639_p5  ;;  %s2164_s14 = scalar_lea.vmem %s2163_s4, 2048 }
  0x85   : > { %s358_s21 = scalar_lea.hbm %s2937_s15, %s1512_s7  ;;  %p2165_p9 = scmp.lt.s32.totalorder %s360_s23, %s2163_s4 }
  0x86   : > { %p2160_p1 = pnand %p2158_p13, %p2146_p6  ;;  %p2166_p8 = scmp.lt.s32.totalorder %s2164_s14, %s2157_s1 }
  0x88   : > { %p2161_p7 = pneg %p2160_p1  ;;  %p2167_p11 = por %p2166_p8, %p2165_p9 }
  0x8a   : > { %p2168_p10 = pnand %p2167_p11, %p2161_p7 }
  0x8c   : > { %2171 = shalt.err (!%p2168_p10)
}
  0x8d   : > { %1888 = dma.hbm_to_vmem [thread:$0]  (!%p2639_p5), %s358_s21, 1024, %s360_s23, %s2545_s2, %s2929_s26, %s2929_s26, %s2928_s6  }
  0x8e   : > { %371 = sbr.rel (%p2465_p4) target bundleno = 728 (0x2d8), region = 52  ;;  %s373_s7 = sand.u32 (!%p2465_p4), 1, %s2304_s12  }
  0x8f   : > { %s1462_s5 = sshll.u32 (!%p2465_p4), %s373_s7, 6  ;;  %s374_s15 = scalar_lea.sflag (!%p2465_p4), [#allocation4], %s373_s7 }
  0x90   : > { %s2654_s4 = scalar_lea.vmem (!%p2465_p4), [#allocation3], %s1462_s5 }
  0x93   : > { %2255 = dma.done.wait (%p2582_p12), %s374_s15, 1024  }
  0x94   : > { %2257 = vsyncadd (%p2582_p12), %s374_s15, 4294966272  ;;  %s2941_s0 = sld [smem:[#allocation18_spill]]  ;;  %s382_s3 = sand.u32 1, %s2459_s19  }
  0x95   : > { %s383_s26 = scalar_lea.sflag [#allocation7], %s382_s3 }
  0x9a   : > { %s384_s2 = sand.u32 1, %s2941_s0  }
  0x9b   : > { %s1463_s6 = sshll.u32 %s384_s2, 6 }
  0x9c   : > { %s2662_s21 = scalar_lea.vmem [#allocation6], %s1463_s6 }
  0x9d   : > { %2259 = dma.done.wait (%p2521_p0), %s383_s26, 1024  }
  0x9e   : > { %2261 = vsyncadd (%p2521_p0), %s383_s26, 4294966272  ;;  %s393_s23 = sand.u32 1, %s2280_s28   ;;  %p2943_p4 = scmp.ne.s32.totalorder %s2933_s11, 0 }
  0x9f   : > { %s1464_s9 = sshll.u32 %s393_s23, 6 }
  0xa0   : > { %s2671_s30 = scalar_lea.vmem [#allocation8], %s1464_s9 }
  0xa1   : > { %2263 = dma.done.wait (%p2943_p4), %s383_s26, 1024  }
  0xa2   : > { %2265 = vsyncadd (%p2943_p4), %s383_s26, 4294966272  ;;  %p2944_p12 = scmp.eq.s32.totalorder %s2459_s19, 0 }
  0xa4   : > { %2267 = dma.done.wait (%p2944_p12), [#allocation10], 4096   ;;  %p2945_p3 = pmov %p2944_p12 }
  0xa5   : > { %s2681_s14 = scalar_lea.vmem [#allocation12], %s1464_s9  ;;  %s2946_s25 = sld [smem:[#allocation19_spill]] }
  0xa6   : > { %2269 = vsyncadd (%p2945_p3), [#allocation10], 4294963200 }
  0xab   : > { %p1468_p0 = scmp.ne.s32.totalorder %s2946_s25, 0 }
  0xad   : > { %454 = sbr.rel (%p1468_p0) target bundleno = 187 (0xbb), region = 76 }
  0xb2   : > { %v2339_v0 = vmov 0.0  }
  0xb3   : > { %455 = vst [vmem:[#allocation2 + $0x30] sm:$0xff] %v2339_v0  ;;  %456 = vst [vmem:[#allocation2] sm:$0xff] %v2339_v0 }
  0xb4   : > { %457 = vst [vmem:[#allocation2 + $0x58] sm:$0xff] %v2339_v0  ;;  %458 = vst [vmem:[#allocation2 + $0x18] sm:$0xff] %v2339_v0 }
  0xb5   : > { %459 = vst [vmem:[#allocation2 + $0x50] sm:$0xff] %v2339_v0  ;;  %460 = vst [vmem:[#allocation2 + $0x68] sm:$0xff] %v2339_v0 }
  0xb6   : > { %461 = vst [vmem:[#allocation2 + $0x8] sm:$0xff] %v2339_v0  ;;  %462 = vst [vmem:[#allocation2 + $0x48] sm:$0xff] %v2339_v0 }
  0xb7   : > { %463 = vst [vmem:[#allocation2 + $0x40] sm:$0xff] %v2339_v0  ;;  %464 = vst [vmem:[#allocation2 + $0x20] sm:$0xff] %v2339_v0 }
  0xb8   : > { %465 = vst [vmem:[#allocation2 + $0x10] sm:$0xff] %v2339_v0  ;;  %466 = vst [vmem:[#allocation2 + $0x38] sm:$0xff] %v2339_v0 }
  0xb9   : > { %467 = vst [vmem:[#allocation2 + $0x60] sm:$0xff] %v2339_v0  ;;  %468 = vst [vmem:[#allocation2 + $0x70] sm:$0xff] %v2339_v0 }
  0xba   : > { %469 = vst [vmem:[#allocation2 + $0x78] sm:$0xff] %v2339_v0  ;;  %470 = vst [vmem:[#allocation2 + $0x28] sm:$0xff] %v2339_v0 }
  0xbb PF: > { %v2020_v1 = vld [vmem:[%s2662_s21 + $0x38] sm:$0xff]   ;;  %v2021_v2 = vld [vmem:[%s2662_s21 + $0x30] sm:$0xff]   ;;  %v2022_v3 = vld [vmem:[%s2662_s21 + $0x28] sm:$0xff]   ;;  %s2947_s19 = sld [smem:[#allocation19_spill]] }
  0xbc   : > { %1696 = vmatprep.subr.bf16.mxu0 %v2020_v1  ;;  %1840 = vmatprep.subr.bf16.mxu1 %v2020_v1  ;;  %v2023_v4 = vld [vmem:[%s2662_s21 + $0x20] sm:$0xff]   ;;  %v2024_v7 = vld [vmem:[%s2662_s21 + $0x18] sm:$0xff]   ;;  %v2025_v8 = vld [vmem:[%s2662_s21 + $0x10] sm:$0xff]  }
  0xbd   : > { %1697 = vmatpush3.bf16.msra.mxu0 %v2020_v1  ;;  %1848 = vmatpush3.bf16.msra.mxu1 %v2020_v1  ;;  %v2028_v5 = vld [vmem:[%s2654_s4] sm:$0xff]   ;;  %v2026_v9 = vld [vmem:[%s2662_s21 + $0x8] sm:$0xff]   ;;  %v2032_v13 = vld [vmem:[%s2654_s4 + $0x10] sm:$0xff]  }
  0xbe   : > { %1698 = vmatprep.subr.bf16.mxu0 %v2021_v2  ;;  %1841 = vmatprep.subr.bf16.mxu1 %v2021_v2  ;;  %v2029_v6 = vld [vmem:[%s2654_s4 + $0x20] sm:$0xff]   ;;  %v2030_v11 = vld [vmem:[%s2654_s4 + $0x8] sm:$0xff]   ;;  %v2033_v14 = vld [vmem:[%s2654_s4 + $0x30] sm:$0xff]  }
  0xbf   : > { %1712 = vmatprep.mubr.bf16.mxu0 %v2028_v5  ;;  %1720 = vmatprep.mubr.bf16.mxu1 %v2029_v6  ;;  %v2027_v10 = vld [vmem:[%s2662_s21] sm:$0xff]   ;;  %v2031_v12 = vld [vmem:[%s2654_s4 + $0x28] sm:$0xff]   ;;  %v2034_v15 = vld [vmem:[%s2654_s4 + $0x18] sm:$0xff]  }
  0xc0   : > { %v2035_v16 = vld [vmem:[%s2654_s4 + $0x38] sm:$0xff]   ;;  %v481_v18 = vld [vmem:[#allocation2 + $0x10] sm:$0xff]  ;;  %v479_v22 = vld [vmem:[#allocation2 + $0x40] sm:$0xff] }
  0xc1   : > { %1699 = vmatpush3.bf16.msra.mxu0 %v2021_v2  ;;  %1849 = vmatpush3.bf16.msra.mxu1 %v2021_v2  ;;  %v473_v17 = vld [vmem:[#allocation2 + $0x58] sm:$0xff]  ;;  %v471_v21 = vld [vmem:[#allocation2 + $0x30] sm:$0xff]  ;;  %v472_v33 = vld [vmem:[#allocation2] sm:$0xff]  ;;  %p1485_p10 = scmp.ne.s32.totalorder %s2947_s19, 1 }
  0xc2   : > { %1700 = vmatprep.subr.bf16.mxu0 %v2022_v3  ;;  %1842 = vmatprep.subr.bf16.mxu1 %v2022_v3  ;;  %v474_v27 = vld [vmem:[#allocation2 + $0x18] sm:$0xff]  ;;  %v480_v34 = vld [vmem:[#allocation2 + $0x20] sm:$0xff]  ;;  %v477_v39 = vld [vmem:[#allocation2 + $0x8] sm:$0xff]  ;;  %s2948_s5 = sld [smem:[#allocation31_spill]] (!%p1485_p10) }
  0xc3   : > { %v482_v28 = vld [vmem:[#allocation2 + $0x38] sm:$0xff]  ;;  %v475_v45 = vld [vmem:[#allocation2 + $0x50] sm:$0xff]  ;;  %v483_v46 = vld [vmem:[#allocation2 + $0x60] sm:$0xff]  ;;  %s2949_s0 = sld [smem:[#allocation32_spill]] (!%p1485_p10) }
  0xc4   : > { %v485_v40 = vld [vmem:[#allocation2 + $0x78] sm:$0xff]  ;;  %v478_v51 = vld [vmem:[#allocation2 + $0x48] sm:$0xff]  ;;  %v484_v58 = vld [vmem:[#allocation2 + $0x70] sm:$0xff]  ;;  %s2950_s2 = sld [smem:[#allocation33_spill]] (!%p1485_p10) }
  0xc5   : > { %1701 = vmatpush3.bf16.msra.mxu0 %v2022_v3  ;;  %1850 = vmatpush3.bf16.msra.mxu1 %v2022_v3  ;;  %v486_v52 = vld [vmem:[#allocation2 + $0x28] sm:$0xff] }
  0xc6   : > { %1702 = vmatprep.subr.bf16.mxu0 %v2023_v4  ;;  %1843 = vmatprep.subr.bf16.mxu1 %v2023_v4  ;;  %v476_v57 = vld [vmem:[#allocation2 + $0x68] sm:$0xff] }
  0xc9   : > { %1703 = vmatpush3.bf16.msra.mxu0 %v2023_v4  ;;  %1851 = vmatpush3.bf16.msra.mxu1 %v2023_v4 }
  0xca   : > { %1704 = vmatprep.subr.bf16.mxu0 %v2024_v7  ;;  %1844 = vmatprep.subr.bf16.mxu1 %v2024_v7 }
  0xcd   : > { %1705 = vmatpush3.bf16.msra.mxu0 %v2024_v7  ;;  %1852 = vmatpush3.bf16.msra.mxu1 %v2024_v7 }
  0xce   : > { %1706 = vmatprep.subr.bf16.mxu0 %v2025_v8  ;;  %1845 = vmatprep.subr.bf16.mxu1 %v2025_v8 }
  0xd1   : > { %1707 = vmatpush3.bf16.msra.mxu0 %v2025_v8  ;;  %1853 = vmatpush3.bf16.msra.mxu1 %v2025_v8 }
  0xd2   : > { %1708 = vmatprep.subr.bf16.mxu0 %v2026_v9  ;;  %1846 = vmatprep.subr.bf16.mxu1 %v2026_v9 }
  0xd5   : > { %1709 = vmatpush3.bf16.msra.mxu0 %v2026_v9  ;;  %1854 = vmatpush3.bf16.msra.mxu1 %v2026_v9 }
  0xd6   : > { %1710 = vmatprep.subr.bf16.mxu0 %v2027_v10  ;;  %1847 = vmatprep.subr.bf16.mxu1 %v2027_v10 }
  0xd9   : > { %1711 = vmatpush3.bf16.msra.mxu0 %v2027_v10  ;;  %1855 = vmatpush3.bf16.msra.mxu1 %v2027_v10 }
  0xdc   : > { %1713 = vmatmul.mubr.bf16.vlgmr.msra.gmra.mxu0 %v2030_v11  ;;  %1721 = vmatmul.mubr.bf16.vlgmr.msra.gmra.mxu1 %v2031_v12 }
  0xdd   : > { %1716 = vmatprep.mubr.bf16.mxu0 %v2032_v13  ;;  %1724 = vmatprep.mubr.bf16.mxu1 %v2033_v14 }
  0xe4   : > { %1717 = vmatmul.mubr.bf16.gmra.mxu0 %v2034_v15  ;;  %1725 = vmatmul.mubr.bf16.gmra.mxu1 %v2035_v16 }
 0x19c   : > { %v1714_v19 = vpop.f32.mrf.mxu0  ;;  %v1722_v20 = vpop.f32.mrf.mxu1 }
 0x19d   : > { %v714_v23 = vadd.f32 %v1714_v19, %v473_v17  ;;  %v722_v24 = vadd.f32 %v1722_v20, %v481_v18 }
 0x19e   : > { %v649_v25 = vpop.f32.mrf.mxu0  ;;  %v681_v26 = vpop.f32.mrf.mxu1 }
 0x19f   : > { %730 = vst [vmem:[#allocation2 + $0x58] sm:$0xff] %v714_v23  ;;  %738 = vst [vmem:[#allocation2 + $0x10] sm:$0xff] %v722_v24  ;;  %v712_v29 = vadd.f32 %v649_v25, %v471_v21  ;;  %v720_v30 = vadd.f32 %v681_v26, %v479_v22 }
 0x1a0   : > { %v1715_v31 = vpop.f32.mrf.mxu0  ;;  %v1723_v32 = vpop.f32.mrf.mxu1 }
 0x1a1   : > { %728 = vst [vmem:[#allocation2 + $0x30] sm:$0xff] %v712_v29  ;;  %736 = vst [vmem:[#allocation2 + $0x40] sm:$0xff] %v720_v30  ;;  %v715_v35 = vadd.f32 %v1715_v31, %v474_v27  ;;  %v723_v36 = vadd.f32 %v1723_v32, %v482_v28 }
 0x1a2   : > { %v652_v37 = vpop.f32.mrf.mxu0  ;;  %v684_v38 = vpop.f32.mrf.mxu1 }
 0x1a3   : > { %731 = vst [vmem:[#allocation2 + $0x18] sm:$0xff] %v715_v35  ;;  %739 = vst [vmem:[#allocation2 + $0x38] sm:$0xff] %v723_v36  ;;  %v713_v41 = vadd.f32 %v652_v37, %v472_v33  ;;  %v721_v42 = vadd.f32 %v684_v38, %v480_v34 }
 0x1a4   : > { %v1718_v43 = vpop.f32.mrf.mxu0  ;;  %v1726_v44 = vpop.f32.mrf.mxu1 }
 0x1a5   : > { %729 = vst [vmem:[#allocation2] sm:$0xff] %v713_v41  ;;  %737 = vst [vmem:[#allocation2 + $0x20] sm:$0xff] %v721_v42  ;;  %v718_v47 = vadd.f32 %v1718_v43, %v477_v39  ;;  %v726_v48 = vadd.f32 %v1726_v44, %v485_v40 }
 0x1a6   : > { %v665_v49 = vpop.f32.mrf.mxu0  ;;  %v697_v50 = vpop.f32.mrf.mxu1 }
 0x1a7   : > { %734 = vst [vmem:[#allocation2 + $0x8] sm:$0xff] %v718_v47  ;;  %742 = vst [vmem:[#allocation2 + $0x78] sm:$0xff] %v726_v48  ;;  %v716_v53 = vadd.f32 %v665_v49, %v475_v45  ;;  %v724_v54 = vadd.f32 %v697_v50, %v483_v46 }
 0x1a8   : > { %v1719_v55 = vpop.f32.mrf.mxu0  ;;  %v1727_v56 = vpop.f32.mrf.mxu1 }
 0x1a9   : > { %732 = vst [vmem:[#allocation2 + $0x50] sm:$0xff] %v716_v53  ;;  %740 = vst [vmem:[#allocation2 + $0x60] sm:$0xff] %v724_v54  ;;  %v719_v59 = vadd.f32 %v1719_v55, %v478_v51  ;;  %v727_v60 = vadd.f32 %v1727_v56, %v486_v52  ;;  %747 = sbr.rel (%p1485_p10) target bundleno = 701 (0x2bd), region = 80 }
 0x1aa   : > { %v668_v61 = vpop.f32.mrf.mxu0  ;;  %v700_v62 = vpop.f32.mrf.mxu1 }
 0x1ab   : > { %735 = vst [vmem:[#allocation2 + $0x48] sm:$0xff] %v719_v59  ;;  %743 = vst [vmem:[#allocation2 + $0x28] sm:$0xff] %v727_v60  ;;  %v717_v63 = vadd.f32 %v668_v61, %v476_v57  ;;  %v725_v0 = vadd.f32 %v700_v62, %v484_v58 }
 0x1ad   : > { %733 = vst [vmem:[#allocation2 + $0x68] sm:$0xff] %v717_v63  ;;  %741 = vst [vmem:[#allocation2 + $0x70] sm:$0xff] %v725_v0 }
 0x1ae   : > { %v827_v1 = vld [vmem:[#allocation11 + $0x78] sm:$0xff]  ;;  %v826_v3 = vld [vmem:[#allocation11 + $0x70] sm:$0xff]  ;;  %v825_v5 = vld [vmem:[#allocation11 + $0x68] sm:$0xff] }
 0x1af   : > { %v779_v2 = vld [vmem:[#allocation9 + $0x78] sm:$0xff]  ;;  %1728 = vmatprep.subr.mxu0 %v827_v1  ;;  %v778_v4 = vld [vmem:[#allocation9 + $0x70] sm:$0xff]  ;;  %v777_v6 = vld [vmem:[#allocation9 + $0x68] sm:$0xff] }
 0x1b0   : > { %1784 = vmatprep.subr.mxu1 %v779_v2  ;;  %1729 = vmatpush3.msra.mxu0 %v827_v1  ;;  %v824_v7 = vld [vmem:[#allocation11 + $0x60] sm:$0xff]  ;;  %v823_v9 = vld [vmem:[#allocation11 + $0x58] sm:$0xff]  ;;  %v822_v11 = vld [vmem:[#allocation11 + $0x50] sm:$0xff] }
 0x1b1   : > { %1785 = vmatpush3.msra.mxu1 %v779_v2  ;;  %1730 = vmatprep.subr.mxu0 %v826_v3  ;;  %v776_v8 = vld [vmem:[#allocation9 + $0x60] sm:$0xff]  ;;  %v775_v10 = vld [vmem:[#allocation9 + $0x58] sm:$0xff]  ;;  %v774_v12 = vld [vmem:[#allocation9 + $0x50] sm:$0xff] }
 0x1b2   : > { %1786 = vmatprep.subr.mxu1 %v778_v4  ;;  %1731 = vmatpush3.msra.mxu0 %v826_v3  ;;  %v821_v13 = vld [vmem:[#allocation11 + $0x48] sm:$0xff]  ;;  %v820_v15 = vld [vmem:[#allocation11 + $0x40] sm:$0xff]  ;;  %v819_v17 = vld [vmem:[#allocation11 + $0x38] sm:$0xff] }
 0x1b3   : > { %1787 = vmatpush3.msra.mxu1 %v778_v4  ;;  %1732 = vmatprep.subr.mxu0 %v825_v5  ;;  %v773_v14 = vld [vmem:[#allocation9 + $0x48] sm:$0xff]  ;;  %v772_v16 = vld [vmem:[#allocation9 + $0x40] sm:$0xff]  ;;  %v771_v18 = vld [vmem:[#allocation9 + $0x38] sm:$0xff] }
 0x1b4   : > { %1788 = vmatprep.subr.mxu1 %v777_v6  ;;  %1733 = vmatpush3.msra.mxu0 %v825_v5  ;;  %v818_v19 = vld [vmem:[#allocation11 + $0x30] sm:$0xff]  ;;  %v817_v21 = vld [vmem:[#allocation11 + $0x28] sm:$0xff]  ;;  %v816_v23 = vld [vmem:[#allocation11 + $0x20] sm:$0xff] }
 0x1b5   : > { %1789 = vmatpush3.msra.mxu1 %v777_v6  ;;  %1734 = vmatprep.subr.mxu0 %v824_v7  ;;  %v770_v20 = vld [vmem:[#allocation9 + $0x30] sm:$0xff]  ;;  %v769_v22 = vld [vmem:[#allocation9 + $0x28] sm:$0xff]  ;;  %v768_v24 = vld [vmem:[#allocation9 + $0x20] sm:$0xff] }
 0x1b6   : > { %1790 = vmatprep.subr.mxu1 %v776_v8  ;;  %1735 = vmatpush3.msra.mxu0 %v824_v7  ;;  %v815_v25 = vld [vmem:[#allocation11 + $0x18] sm:$0xff]  ;;  %v814_v27 = vld [vmem:[#allocation11 + $0x10] sm:$0xff]  ;;  %v1531_v29 = vld [vmem:[%s2671_s30] sm:$0xff]  }
 0x1b7   : > { %1791 = vmatpush3.msra.mxu1 %v776_v8  ;;  %1736 = vmatprep.subr.mxu0 %v823_v9  ;;  %v767_v26 = vld [vmem:[#allocation9 + $0x18] sm:$0xff]  ;;  %v766_v28 = vld [vmem:[#allocation9 + $0x10] sm:$0xff]  ;;  %v813_v30 = vld [vmem:[#allocation11 + $0x8] sm:$0xff]  ;;  %v1532_v34 = vunpack.c.l.bf16 %v1531_v29  ;;  %v1533_v36 = vunpack.c.h.bf16 %v1531_v29 }
 0x1b8   : > { %1792 = vmatprep.subr.mxu1 %v775_v10  ;;  %1737 = vmatpush3.msra.mxu0 %v823_v9  ;;  %v765_v31 = vld [vmem:[#allocation9 + $0x8] sm:$0xff]  ;;  %v812_v32 = vld [vmem:[#allocation11] sm:$0xff]  ;;  %v748_v37 = vld [vmem:[#allocation2 + $0x30] sm:$0xff] }
 0x1b9   : > { %1793 = vmatpush3.msra.mxu1 %v775_v10  ;;  %1738 = vmatprep.subr.mxu0 %v822_v11  ;;  %v764_v33 = vld [vmem:[#allocation9] sm:$0xff]  ;;  %v1602_v35 = vld [vmem:[%s2671_s30 + $0x8] sm:$0xff]   ;;  %v750_v40 = vld [vmem:[#allocation2 + $0x58] sm:$0xff] }
 0x1ba   : > { %1794 = vmatprep.subr.mxu1 %v774_v12  ;;  %1739 = vmatpush3.msra.mxu0 %v822_v11  ;;  %v749_v38 = vld [vmem:[#allocation2] sm:$0xff]  ;;  %v1536_v39 = vunpack.c.l.bf16 %v1602_v35  ;;  %v1603_v41 = vld [vmem:[%s2671_s30 + $0x10] sm:$0xff]   ;;  %v1537_v42 = vunpack.c.h.bf16 %v1602_v35  ;;  %v751_v43 = vld [vmem:[#allocation2 + $0x18] sm:$0xff] }
 0x1bb   : > { %1795 = vmatpush3.msra.mxu1 %v774_v12  ;;  %1740 = vmatprep.subr.mxu0 %v821_v13  ;;  %v1540_v44 = vunpack.c.l.bf16 %v1603_v41  ;;  %v752_v45 = vld [vmem:[#allocation2 + $0x50] sm:$0xff]  ;;  %v1604_v46 = vld [vmem:[%s2671_s30 + $0x18] sm:$0xff]   ;;  %v1541_v47 = vunpack.c.h.bf16 %v1603_v41  ;;  %v753_v48 = vld [vmem:[#allocation2 + $0x68] sm:$0xff] }
 0x1bc   : > { %1796 = vmatprep.subr.mxu1 %v773_v14  ;;  %1741 = vmatpush3.msra.mxu0 %v821_v13  ;;  %v1544_v49 = vunpack.c.l.bf16 %v1604_v46  ;;  %v754_v50 = vld [vmem:[#allocation2 + $0x8] sm:$0xff]  ;;  %v1605_v51 = vld [vmem:[%s2671_s30 + $0x20] sm:$0xff]   ;;  %v1545_v52 = vunpack.c.h.bf16 %v1604_v46  ;;  %v758_v60 = vld [vmem:[#allocation2 + $0x10] sm:$0xff] }
 0x1bd   : > { %1797 = vmatpush3.msra.mxu1 %v773_v14  ;;  %1742 = vmatprep.subr.mxu0 %v820_v15  ;;  %v755_v53 = vld [vmem:[#allocation2 + $0x48] sm:$0xff]  ;;  %v1548_v54 = vunpack.c.l.bf16 %v1605_v51  ;;  %v756_v55 = vld [vmem:[#allocation2 + $0x40] sm:$0xff]  ;;  %v1549_v57 = vunpack.c.h.bf16 %v1605_v51  ;;  %v1607_v61 = vld [vmem:[%s2671_s30 + $0x30] sm:$0xff]  }
 0x1be   : > { %1798 = vmatprep.subr.mxu1 %v772_v16  ;;  %1743 = vmatpush3.msra.mxu0 %v820_v15  ;;  %v1606_v56 = vld [vmem:[%s2671_s30 + $0x28] sm:$0xff]   ;;  %v757_v58 = vld [vmem:[#allocation2 + $0x20] sm:$0xff]  ;;  %v759_v63 = vld [vmem:[#allocation2 + $0x38] sm:$0xff]  ;;  %v1556_v0 = vunpack.c.l.bf16 %v1607_v61  ;;  %v1557_v3 = vunpack.c.h.bf16 %v1607_v61 }
 0x1bf   : > { %1799 = vmatpush3.msra.mxu1 %v772_v16  ;;  %1744 = vmatprep.subr.mxu0 %v819_v17  ;;  %v1552_v59 = vunpack.c.l.bf16 %v1606_v56  ;;  %v1553_v62 = vunpack.c.h.bf16 %v1606_v56  ;;  %v760_v1 = vld [vmem:[#allocation2 + $0x60] sm:$0xff]  ;;  %v1608_v2 = vld [vmem:[%s2671_s30 + $0x38] sm:$0xff]   ;;  %v761_v4 = vld [vmem:[#allocation2 + $0x70] sm:$0xff] }
 0x1c0   : > { %1800 = vmatprep.subr.mxu1 %v771_v18  ;;  %1745 = vmatpush3.msra.mxu0 %v819_v17  ;;  %v1560_v5 = vunpack.c.l.bf16 %v1608_v2  ;;  %v762_v6 = vld [vmem:[#allocation2 + $0x78] sm:$0xff]  ;;  %v1561_v7 = vunpack.c.h.bf16 %v1608_v2  ;;  %v763_v8 = vld [vmem:[#allocation2 + $0x28] sm:$0xff]  ;;  %v2712_v11 = vld [vmem:[%s2948_s5] ss:$0 sm:$0xff] }
 0x1c1   : > { %1801 = vmatpush3.msra.mxu1 %v771_v18  ;;  %1746 = vmatprep.subr.mxu0 %v818_v19  ;;  %v2717_v13 = vld [vmem:[%s2949_s0] ss:$0 sm:$0xff] }
 0x1c2   : > { %1802 = vmatprep.subr.mxu1 %v770_v20  ;;  %1747 = vmatpush3.msra.mxu0 %v818_v19  ;;  %v2723_v18 = vld [vmem:[%s2950_s2] ss:$0 sm:$0xff] }
 0x1c3   : > { %1803 = vmatpush3.msra.mxu1 %v770_v20  ;;  %1748 = vmatprep.subr.mxu0 %v817_v21 }
 0x1c4   : > { %1804 = vmatprep.subr.mxu1 %v769_v22  ;;  %1749 = vmatpush3.msra.mxu0 %v817_v21 }
 0x1c5   : > { %1805 = vmatpush3.msra.mxu1 %v769_v22  ;;  %1750 = vmatprep.subr.mxu0 %v816_v23 }
 0x1c6   : > { %1806 = vmatprep.subr.mxu1 %v768_v24  ;;  %1751 = vmatpush3.msra.mxu0 %v816_v23 }
 0x1c7   : > { %1807 = vmatpush3.msra.mxu1 %v768_v24  ;;  %1752 = vmatprep.subr.mxu0 %v815_v25 }
 0x1c8   : > { %1808 = vmatprep.subr.mxu1 %v767_v26  ;;  %1753 = vmatpush3.msra.mxu0 %v815_v25 }
 0x1c9   : > { %1809 = vmatpush3.msra.mxu1 %v767_v26  ;;  %1754 = vmatprep.subr.mxu0 %v814_v27 }
 0x1ca   : > { %1810 = vmatprep.subr.mxu1 %v766_v28  ;;  %1755 = vmatpush3.msra.mxu0 %v814_v27 }
 0x1cb   : > { %1811 = vmatpush3.msra.mxu1 %v766_v28  ;;  %1756 = vmatprep.subr.mxu0 %v813_v30 }
 0x1cc   : > { %1812 = vmatprep.subr.mxu1 %v765_v31  ;;  %1757 = vmatpush3.msra.mxu0 %v813_v30 }
 0x1cd   : > { %1813 = vmatpush3.msra.mxu1 %v765_v31  ;;  %1758 = vmatprep.subr.mxu0 %v812_v32 }
 0x1ce   : > { %1814 = vmatprep.subr.mxu1 %v764_v33  ;;  %1759 = vmatpush3.msra.mxu0 %v812_v32 }
 0x1cf   : > { %1760 = vmatprep.mubr.f32.mxu0 %v1532_v34  ;;  %1815 = vmatpush3.msra.mxu1 %v764_v33 }
 0x1d0   : > { %1816 = vmatprep.mubr.f32.mxu1 %v748_v37  ;;  %1761 = vmatmul.mubr.f32.vlgmr.msra.gmra.mxu0 %v1533_v36 }
 0x1d1   : > { %1817 = vmatmul.mubr.f32.vlgmr.msra.gmra.mxu1 %v749_v38  ;;  %1763 = vmatprep.mubr.f32.mxu0 %v1536_v39 }
 0x1d2   : > { %1819 = vmatprep.mubr.f32.mxu1 %v750_v40 }
 0x1d4   : > { %1764 = vmatmul.mubr.f32.gmra.mxu0 %v1537_v42 }
 0x1d5   : > { %1820 = vmatmul.mubr.f32.gmra.mxu1 %v751_v43  ;;  %1766 = vmatprep.mubr.f32.mxu0 %v1540_v44 }
 0x1d6   : > { %1822 = vmatprep.mubr.f32.mxu1 %v752_v45 }
 0x1d8   : > { %1767 = vmatmul.mubr.f32.gmra.mxu0 %v1541_v47 }
 0x1d9   : > { %1823 = vmatmul.mubr.f32.gmra.mxu1 %v753_v48  ;;  %1769 = vmatprep.mubr.f32.mxu0 %v1544_v49 }
 0x1da   : > { %1825 = vmatprep.mubr.f32.mxu1 %v754_v50 }
 0x1dc   : > { %1770 = vmatmul.mubr.f32.gmra.mxu0 %v1545_v52 }
 0x1dd   : > { %1826 = vmatmul.mubr.f32.gmra.mxu1 %v755_v53  ;;  %1772 = vmatprep.mubr.f32.mxu0 %v1548_v54 }
 0x1de   : > { %1828 = vmatprep.mubr.f32.mxu1 %v756_v55 }
 0x1e0   : > { %1773 = vmatmul.mubr.f32.gmra.mxu0 %v1549_v57 }
 0x1e1   : > { %1829 = vmatmul.mubr.f32.gmra.mxu1 %v757_v58  ;;  %1775 = vmatprep.mubr.f32.mxu0 %v1552_v59 }
 0x1e2   : > { %1831 = vmatprep.mubr.f32.mxu1 %v758_v60 }
 0x1e4   : > { %1776 = vmatmul.mubr.f32.gmra.mxu0 %v1553_v62 }
 0x1e5   : > { %1832 = vmatmul.mubr.f32.gmra.mxu1 %v759_v63  ;;  %1778 = vmatprep.mubr.f32.mxu0 %v1556_v0 }
 0x1e6   : > { %1834 = vmatprep.mubr.f32.mxu1 %v760_v1 }
 0x1e8   : > { %1779 = vmatmul.mubr.f32.gmra.mxu0 %v1557_v3 }
 0x1e9   : > { %1835 = vmatmul.mubr.f32.gmra.mxu1 %v761_v4  ;;  %1781 = vmatprep.mubr.f32.mxu0 %v1560_v5 }
 0x1ea   : > { %1837 = vmatprep.mubr.f32.mxu1 %v762_v6 }
 0x1ec   : > { %1782 = vmatmul.mubr.f32.gmra.mxu0 %v1561_v7 }
 0x1ed   : > { %1838 = vmatmul.mubr.f32.gmra.mxu1 %v763_v8 }
 0x290   : > { %v1762_v9 = vpop.f32.mrf.mxu0 }
 0x291   : > { %v1818_v10 = vpop.f32.mrf.mxu1 }
 0x292   : > { %v1045_v12 = vadd.f32 %v1818_v10, %v1762_v9  ;;  %v894_v14 = vpop.f32.mrf.mxu0 }
 0x293   : > { %v1039_v15 = vpop.f32.mrf.mxu1 }
 0x294   : > { %v1126_v16 = vadd.f32 %v2712_v11, %v1045_v12  ;;  %v1040_v17 = vadd.f32 %v1039_v15, %v894_v14  ;;  %v1765_v19 = vpop.f32.mrf.mxu0 }
 0x295   : > { %v1821_v20 = vpop.f32.mrf.mxu1 }
 0x296   : > { %v1149_v21 = vmul.f32 %v2717_v13, %v1126_v16  ;;  %v1125_v22 = vadd.f32 %v2712_v11, %v1040_v17  ;;  %v1055_v23 = vadd.f32 %v1821_v20, %v1765_v19  ;;  %v904_v24 = vpop.f32.mrf.mxu0 }
 0x297   : > { %v1049_v25 = vpop.f32.mrf.mxu1 }
 0x298   : > { %v1172_v26 = vadd.f32 %v2723_v18, %v1149_v21  ;;  %v1148_v27 = vmul.f32 %v2717_v13, %v1125_v22  ;;  %v1128_v28 = vadd.f32 %v2712_v11, %v1055_v23  ;;  %v1050_v29 = vadd.f32 %v1049_v25, %v904_v24  ;;  %v1768_v30 = vpop.f32.mrf.mxu0 }
 0x299   : > { %v1824_v31 = vpop.f32.mrf.mxu1 }
 0x29a   : > { %v1171_v32 = vadd.f32 %v2723_v18, %v1148_v27  ;;  %v1151_v33 = vmul.f32 %v2717_v13, %v1128_v28  ;;  %v1127_v34 = vadd.f32 %v2712_v11, %v1050_v29  ;;  %v1188_v35 = vmax.f32 %v1172_v26, 0.0  ;;  %v914_v37 = vpop.f32.mrf.mxu0 }
 0x29b   : > { %v1065_v36 = vadd.f32 %v1824_v31, %v1768_v30  ;;  %v1059_v38 = vpop.f32.mrf.mxu1 }
 0x29c   : > { %v1187_v39 = vmax.f32 %v1171_v32, 0.0  ;;  %v1174_v40 = vadd.f32 %v2723_v18, %v1151_v33  ;;  %v1150_v41 = vmul.f32 %v2717_v13, %v1127_v34  ;;  %v1060_v42 = vadd.f32 %v1059_v38, %v914_v37  ;;  %v1771_v44 = vpop.f32.mrf.mxu0 }
 0x29d   : > { %v1130_v43 = vadd.f32 %v2712_v11, %v1065_v36  ;;  %v1827_v45 = vpop.f32.mrf.mxu1 }
 0x29e   : > { %v1565_v46 = vpack.c.bf16 %v1188_v35, %v1187_v39  ;;  %v1173_v47 = vadd.f32 %v2723_v18, %v1150_v41  ;;  %v1129_v48 = vadd.f32 %v2712_v11, %v1060_v42  ;;  %v1075_v50 = vadd.f32 %v1827_v45, %v1771_v44  ;;  %v924_v51 = vpop.f32.mrf.mxu0 }
 0x29f   : > { %v1153_v49 = vmul.f32 %v2717_v13, %v1130_v43  ;;  %v1069_v52 = vpop.f32.mrf.mxu1  ;;  %v1190_v53 = vmax.f32 %v1174_v40, 0.0 }
 0x2a0   : > { %1566 = vst [vmem:[%s2681_s14] sm:$0xff] %v1565_v46   ;;  %v1189_v54 = vmax.f32 %v1173_v47, 0.0  ;;  %v1152_v55 = vmul.f32 %v2717_v13, %v1129_v48  ;;  %v1070_v56 = vadd.f32 %v1069_v52, %v924_v51  ;;  %v1132_v58 = vadd.f32 %v2712_v11, %v1075_v50  ;;  %v1774_v59 = vpop.f32.mrf.mxu0 }
 0x2a1   : > { %v1176_v57 = vadd.f32 %v2723_v18, %v1153_v49  ;;  %v1830_v60 = vpop.f32.mrf.mxu1 }
 0x2a2   : > { %v1570_v61 = vpack.c.bf16 %v1190_v53, %v1189_v54  ;;  %v1175_v62 = vadd.f32 %v2723_v18, %v1152_v55  ;;  %v1131_v63 = vadd.f32 %v2712_v11, %v1070_v56  ;;  %v1085_v0 = vadd.f32 %v1830_v60, %v1774_v59  ;;  %v934_v3 = vpop.f32.mrf.mxu0 }
 0x2a3   : > { %v1192_v1 = vmax.f32 %v1176_v57, 0.0  ;;  %v1155_v2 = vmul.f32 %v2717_v13, %v1132_v58  ;;  %v1079_v4 = vpop.f32.mrf.mxu1 }
 0x2a4   : > { %1609 = vst [vmem:[%s2681_s14 + $0x8] sm:$0xff] %v1570_v61   ;;  %v1191_v5 = vmax.f32 %v1175_v62, 0.0  ;;  %v1154_v6 = vmul.f32 %v2717_v13, %v1131_v63  ;;  %v1134_v7 = vadd.f32 %v2712_v11, %v1085_v0  ;;  %v1080_v8 = vadd.f32 %v1079_v4, %v934_v3  ;;  %v1777_v10 = vpop.f32.mrf.mxu0 }
 0x2a5   : > { %v1178_v9 = vadd.f32 %v2723_v18, %v1155_v2  ;;  %v1833_v12 = vpop.f32.mrf.mxu1 }
 0x2a6   : > { %v1575_v14 = vpack.c.bf16 %v1192_v1, %v1191_v5  ;;  %v1177_v15 = vadd.f32 %v2723_v18, %v1154_v6  ;;  %v1157_v16 = vmul.f32 %v2717_v13, %v1134_v7  ;;  %v1133_v17 = vadd.f32 %v2712_v11, %v1080_v8  ;;  %v944_v21 = vpop.f32.mrf.mxu0 }
 0x2a7   : > { %v1194_v19 = vmax.f32 %v1178_v9, 0.0  ;;  %v1095_v20 = vadd.f32 %v1833_v12, %v1777_v10  ;;  %v1089_v22 = vpop.f32.mrf.mxu1 }
 0x2a8   : > { %1610 = vst [vmem:[%s2681_s14 + $0x10] sm:$0xff] %v1575_v14   ;;  %v1193_v23 = vmax.f32 %v1177_v15, 0.0  ;;  %v1180_v24 = vadd.f32 %v2723_v18, %v1157_v16  ;;  %v1156_v25 = vmul.f32 %v2717_v13, %v1133_v17  ;;  %v1090_v26 = vadd.f32 %v1089_v22, %v944_v21  ;;  %v1780_v28 = vpop.f32.mrf.mxu0 }
 0x2a9   : > { %v1136_v27 = vadd.f32 %v2712_v11, %v1095_v20  ;;  %v1836_v29 = vpop.f32.mrf.mxu1 }
 0x2aa   : > { %v1580_v30 = vpack.c.bf16 %v1194_v19, %v1193_v23  ;;  %v1179_v31 = vadd.f32 %v2723_v18, %v1156_v25  ;;  %v1135_v32 = vadd.f32 %v2712_v11, %v1090_v26  ;;  %v1105_v34 = vadd.f32 %v1836_v29, %v1780_v28  ;;  %v954_v35 = vpop.f32.mrf.mxu0 }
 0x2ab   : > { %v1159_v33 = vmul.f32 %v2717_v13, %v1136_v27  ;;  %v1099_v36 = vpop.f32.mrf.mxu1  ;;  %v1196_v37 = vmax.f32 %v1180_v24, 0.0 }
 0x2ac   : > { %1611 = vst [vmem:[%s2681_s14 + $0x18] sm:$0xff] %v1580_v30   ;;  %v1195_v38 = vmax.f32 %v1179_v31, 0.0  ;;  %v1158_v39 = vmul.f32 %v2717_v13, %v1135_v32  ;;  %v1100_v40 = vadd.f32 %v1099_v36, %v954_v35  ;;  %v1138_v42 = vadd.f32 %v2712_v11, %v1105_v34  ;;  %v1783_v43 = vpop.f32.mrf.mxu0 }
 0x2ad   : > { %v1182_v41 = vadd.f32 %v2723_v18, %v1159_v33  ;;  %v1839_v44 = vpop.f32.mrf.mxu1 }
 0x2ae   : > { %v1585_v45 = vpack.c.bf16 %v1196_v37, %v1195_v38  ;;  %v1181_v46 = vadd.f32 %v2723_v18, %v1158_v39  ;;  %v1137_v47 = vadd.f32 %v2712_v11, %v1100_v40  ;;  %v1115_v48 = vadd.f32 %v1839_v44, %v1783_v43  ;;  %v964_v51 = vpop.f32.mrf.mxu0 }
 0x2af   : > { %v1198_v49 = vmax.f32 %v1182_v41, 0.0  ;;  %v1161_v50 = vmul.f32 %v2717_v13, %v1138_v42  ;;  %v1109_v52 = vpop.f32.mrf.mxu1 }
 0x2b0   : > { %1612 = vst [vmem:[%s2681_s14 + $0x20] sm:$0xff] %v1585_v45   ;;  %v1197_v53 = vmax.f32 %v1181_v46, 0.0  ;;  %v1160_v54 = vmul.f32 %v2717_v13, %v1137_v47  ;;  %v1140_v55 = vadd.f32 %v2712_v11, %v1115_v48  ;;  %v1110_v56 = vadd.f32 %v1109_v52, %v964_v51 }
 0x2b1   : > { %v1184_v57 = vadd.f32 %v2723_v18, %v1161_v50 }
 0x2b2   : > { %v1590_v58 = vpack.c.bf16 %v1198_v49, %v1197_v53  ;;  %v1183_v59 = vadd.f32 %v2723_v18, %v1160_v54  ;;  %v1163_v60 = vmul.f32 %v2717_v13, %v1140_v55  ;;  %v1139_v61 = vadd.f32 %v2712_v11, %v1110_v56 }
 0x2b3   : > { %v1200_v62 = vmax.f32 %v1184_v57, 0.0 }
 0x2b4   : > { %1613 = vst [vmem:[%s2681_s14 + $0x28] sm:$0xff] %v1590_v58   ;;  %v1199_v63 = vmax.f32 %v1183_v59, 0.0  ;;  %v1186_v0 = vadd.f32 %v2723_v18, %v1163_v60  ;;  %v1162_v1 = vmul.f32 %v2717_v13, %v1139_v61 }
 0x2b6   : > { %v1595_v2 = vpack.c.bf16 %v1200_v62, %v1199_v63  ;;  %v1185_v3 = vadd.f32 %v2723_v18, %v1162_v1  ;;  %v1202_v4 = vmax.f32 %v1186_v0, 0.0 }
 0x2b8   : > { %1614 = vst [vmem:[%s2681_s14 + $0x30] sm:$0xff] %v1595_v2   ;;  %v1201_v5 = vmax.f32 %v1185_v3, 0.0 }
 0x2ba   : > { %v1600_v6 = vpack.c.bf16 %v1202_v4, %v1201_v5 }
 0x2bc   : > { %1615 = vst [vmem:[%s2681_s14 + $0x38] sm:$0xff] %v1600_v6  }
 0x2bd PF: > { %s2951_s6 = sld [smem:[#allocation20_spill]]  ;;  %s1297_s11 = sshll.u32 %s2681_s14, 4  ;;  %s2787_s11 = int_to_ptr.vmem [resolvable:$true] %s1297_s11 }
 0x2be   : > { %s2952_s30 = sld [smem:[#allocation34_spill]]  ;;  %s2791_s7 = scalar_lea.sflag [#allocation5], %s393_s23 }
 0x2bf   : > { %s2172_s5 = scalar_lea.vmem %s2787_s11, 1024  ;;  %p2954_p8 = scmp.ne.s32.totalorder %s2935_s22, 0 }
 0x2c0   : > { %p2173_p11 = scmp.ne.s32.totalorder %s2787_s11, %s2172_s5  ;;  %s2340_s15 = smov [#allocation12]  }
 0x2c1   : > { %s2176_s4 = sshll.u32 %s2340_s15, 4  ;;  %s2177_s4 = int_to_ptr.vmem [resolvable:$false] %s2176_s4 }
 0x2c2   : > { %p2174_p2 = pnand %p2173_p11, %p2954_p8  ;;  %s2178_s0 = scalar_lea.vmem %s2177_s4, 2048 }
 0x2c3   : > { %s1529_s26 = sshll.u32 %s2951_s6, 10  ;;  %p2179_p6 = scmp.lt.s32.totalorder %s2787_s11, %s2177_s4 }
 0x2c4   : > { %s2953_s25 = smov %s2952_s30  ;;  %s2784_s19 = scalar_lea.hbm %s2952_s30, %s1529_s26 }
 0x2c5   : > { %p2175_p5 = pneg %p2174_p2  ;;  %p2180_p13 = scmp.lt.s32.totalorder %s2178_s0, %s2172_s5 }
 0x2c7   : > { %p2181_p1 = por %p2180_p13, %p2179_p6 }
 0x2c9   : > { %p2182_p7 = pnand %p2181_p1, %p2175_p5 }
 0x2cb   : > { %2185 = shalt.err (!%p2182_p7)
}
 0x2cc   : > { %s2186_s23 = scalar_lea.hbm %s2784_s19, 1024  ;;  %s2190_s3 = scalar_lea.hbm %s2953_s25, 2048 }
 0x2cd   : > { %p2187_p9 = scmp.ne.s32.totalorder %s2784_s19, %s2186_s23  ;;  %p2191_p3 = scmp.lt.s32.totalorder %s2784_s19, %s2953_s25 }
 0x2ce   : > { %p2192_p0 = scmp.lt.s32.totalorder %s2190_s3, %s2186_s23 }
 0x2cf   : > { %p2188_p4 = pnand %p2187_p9, %p2954_p8 }
 0x2d0   : > { %p2193_p10 = por %p2192_p0, %p2191_p3 }
 0x2d1   : > { %p2189_p12 = pneg %p2188_p4 }
 0x2d3   : > { %p2194_p11 = pnand %p2193_p10, %p2189_p12 }
 0x2d5   : > { %2197 = shalt.err (!%p2194_p11)
}
 0x2d6   : > { %s2341_s26 = smov 64   ;;  %s2342_s21 = smov 4  }
 0x2d7   : > { %1870 = dma.vmem_to_hbm [thread:$0]  (%p2954_p8), %s2787_s11, 1024, %s2784_s19, %s2791_s7, %s2341_s26, %s2341_s26, %s2342_s21  }
 0x2d8 PF: > { %p1898_p2 = scmp.ge.s32.totalorder %s2328_s18, 2  ;;  %s1312_s9 = sand.u32 1, %s2276_s27  }
 0x2d9   : > { %p2955_p5 = scmp.ne.s32.totalorder %s2936_s24, 0  ;;  %s1313_s30 = scalar_lea.sflag [#allocation5], %s1312_s9 }
 0x2db   : > { %p1890_p6 = pnand %p1898_p2, %p2955_p5 }
 0x2dd   : > { %p1891_p13 = pneg %p1890_p6 }
 0x2df   : > { %2271 = dma.done.wait (%p1891_p13), %s1313_s30, 1024  }
 0x2e0   : > { %2273 = vsyncadd (%p1891_p13), %s1313_s30, 4294966272  ;;  %s28_s18 = sadd.s32 1, %s2328_s18   ;;  %s2957_s30 = sld [smem:[#allocation18_spill]] }
 0x2e1   : > { %p2819_p1 = scmp.ge.s32.totalorder %s28_s18, 6   ;;  %s2958_s22 = sld [smem:[#allocation24_spill]] }
 0x2e2   : > { %s2959_s24 = sld [smem:[#allocation22_spill]]  ;;  %s2961_s27 = smov %s2280_s28 }
 0x2e3   : > { %s2960_s19 = sld [smem:[#allocation23_spill]]  ;;  %s2962_s28 = smov %s2284_s29 }
 0x2e4   : > { %s2963_s29 = smov %s2608_s8  ;;  %s2964_s9 = smov %s2296_s10 }
 0x2e5   : > { %s2966_s11 = smov %s2304_s12  ;;  %s2967_s12 = smov %s2308_s13 }
 0x2e6   : > { %s2968_s13 = smov %s2570_s20  ;;  %s2969_s14 = smov %s2320_s16 }
 0x2e7   : > { %s2965_s10 = smov %s2958_s22  ;;  %s2970_s15 = smov %s2324_s17 }
 0x2e8   : > { %s2971_s16 = smov %s2959_s24  ;;  %27 = sbr.rel (!%p2819_p1) target bundleno = 23 (0x17), region = 137 }
 0x2e9   : > { %s2972_s17 = smov %s2960_s19 }
 0x2ed   :  { %1318 = vsyncpa [#allocation4], 1 }
 0x2ee   :  { %1320 = vsyncpa [#allocation4 + $0x1], 1 }
 0x2ef   :  { %1321 = vsyncpa [#allocation7], 1 }
 0x2f0   :  { %1323 = vsyncpa [#allocation7 + $0x1], 1 }
 0x2f1   :  { %1324 = vsyncpa [#allocation10], 1 }
 0x2f2   :  { %1325 = vsyncpa [#allocation5], 1 }
 0x2f3   :  { %1327 = vsyncpa [#allocation5 + $0x1], 1 }

</bundles_post_ra>
